<compile_context>
chip_gen: v7x
topology: tpu7x:2x2x1
jax: 0.10.0
libtpu: 0.0.40
codegen_flags: <defaults>
</compile_context>

<pallas_src>
import jax
import jax.numpy as jnp
from jax.experimental import pallas as pl
from jax.experimental.pallas import tpu as pltpu


def _policy_kernel(x_ref,
                   w1_ref, b1_ref,
                   w2_ref, b2_ref,
                   wh_ref, bh_ref,
                   out_ref):
    """One batch tile, batch on the lane axis.

    x_ref   : [state_dim, TB]
    w*_ref  : PyTorch-layout weights [out, in]; b*_ref: [out, 1] column biases
    out_ref : [2*action_dim, TB]  (rows [0:A) = mu, [A:2A) = sigma_sq)
    """
    xT = x_ref[...]                                            # [S, TB]

    # layer 1 + ReLU (dropout = identity in eval mode); bias/ReLU ride the VPU
    h1 = jnp.dot(w1_ref[...], xT, preferred_element_type=jnp.float32) + b1_ref[...]
    h1 = jnp.maximum(h1, 0.0)                                  # [H, TB]

    # layer 2 + ReLU
    h2 = jnp.dot(w2_ref[...], h1, preferred_element_type=jnp.float32) + b2_ref[...]
    h2 = jnp.maximum(h2, 0.0)                                  # [H//2, TB]

    # fused heads -> lane-dense output store
    out = jnp.dot(wh_ref[...], h2, preferred_element_type=jnp.float32) + bh_ref[...]
    out_ref[...] = out.astype(out_ref.dtype)                   # [2A, TB]


def _round_up(n, m):
    return ((n + m - 1) // m) * m


def reinforce_policy_forward(x, params, *, block_b=4096):
    """x: [B, state_dim] float32.

    params: PyTorch-layout weights ([out, in]) and column biases ([out, 1]).
    Returns (mu, sigma_sq), each [B, action_dim] float32.
    """
    B, state_dim = x.shape
    action_dim = params["w3"].shape[0]
    hidden = params["w1"].shape[0]
    h2_dim = params["w2"].shape[0]

    # Fuse the two heads into one matmul / one wider lane-dense output slab.
    wh = jnp.concatenate([params["w3"], params["w3_"]], axis=0)    # [2A, H//2]
    bh = jnp.concatenate([params["b3"], params["b3_"]], axis=0)    # [2A, 1]
    w1, b1 = params["w1"], params["b1"]
    w2, b2 = params["w2"], params["b2"]

    # Layout plumbing in the wrapper: batch goes on the lane axis.
    xT = x.T                                                       # [S, B]

    # Lane tile: multiple of 128 (or the full batch when B <= 128). Aim for a
    # >= 2-step grid so "parallel" sharding keeps both v7x TensorCores busy,
    # capped at block_b to amortize per-step overhead.
    if B <= 128:
        tb = B
    else:
        half = -(-B // 2)                                          # cdiv(B, 2)
        tb = min(_round_up(block_b, 128), max(128, _round_up(half, 128)))
    grid = pl.cdiv(B, tb)

    def full(a):
        # Weights / biases: whole array, VMEM-resident block every step.
        return pl.BlockSpec(a.shape, lambda i: (0,) * a.ndim)

    outT = pl.pallas_call(
        _policy_kernel,
        out_shape=jax.ShapeDtypeStruct((2 * action_dim, B), jnp.float32),
        grid=(grid,),
        in_specs=[
            pl.BlockSpec((state_dim, tb), lambda i: (0, i)),       # x tiled over lanes
            full(w1), full(b1),
            full(w2), full(b2),
            full(wh), full(bh),
        ],
        out_specs=pl.BlockSpec((2 * action_dim, tb), lambda i: (0, i)),
        compiler_params=pltpu.CompilerParams(
            dimension_semantics=("parallel",)),                    # batch across TCs
    )(xT, w1, b1, w2, b2, wh, bh)

    mu = outT[:action_dim, :].T                                    # [B, A]
    sigma_sq = outT[action_dim:, :].T                              # [B, A]
    return mu, sigma_sq


def init_params(key, state_dim, action_dim, hidden_size):
    """Deterministic init matching nn.Linear's U(-1/sqrt(fan_in), 1/sqrt(fan_in)).

    Weights use PyTorch's natural [out, in] layout (what the transposed-layout
    kernel wants); biases are [out, 1] columns so they broadcast over lanes.
    """
    h2 = hidden_size // 2
    dims = [
        ("w1", "b1", state_dim, hidden_size),
        ("w2", "b2", hidden_size, h2),
        ("w3", "b3", h2, action_dim),
        ("w3_", "b3_", h2, action_dim),
    ]
    params = {}
    for wname, bname, fan_in, fan_out in dims:
        key, kw, kb = jax.random.split(key, 3)
        bound = 1.0 / (fan_in ** 0.5)
        params[wname] = jax.random.uniform(
            kw, (fan_out, fan_in), jnp.float32, minval=-bound, maxval=bound)
        params[bname] = jax.random.uniform(
            kb, (fan_out, 1), jnp.float32, minval=-bound, maxval=bound)
    return params


def _reference_forward(x, params):
    hp = jax.lax.Precision.HIGHEST
    h1 = jnp.maximum(jnp.dot(x, params["w1"].T, precision=hp) + params["b1"].T, 0.0)
    h2 = jnp.maximum(jnp.dot(h1, params["w2"].T, precision=hp) + params["b2"].T, 0.0)
    mu = jnp.dot(h2, params["w3"].T, precision=hp) + params["b3"].T
    sigma_sq = jnp.dot(h2, params["w3_"].T, precision=hp) + params["b3_"].T
    return mu, sigma_sq


if __name__ == "__main__":
    state_dim, action_dim, hidden_size = 16, 4, 32

    key = jax.random.PRNGKey(0)
    key, kx1, kx2 = jax.random.split(key, 3)
    params = init_params(key, state_dim, action_dim, hidden_size)

    # Small case (single block, tb == B)
    batch = 2
    x = jax.random.normal(kx1, (batch, state_dim), jnp.float32)
    mu, sigma_sq = reinforce_policy_forward(x, params)
    jax.block_until_ready((mu, sigma_sq))
    mu_ref, sig_ref = _reference_forward(x, params)
    assert mu.shape == (batch, action_dim) and sigma_sq.shape == (batch, action_dim)
    assert jnp.allclose(mu, mu_ref, atol=1e-3, rtol=1e-3), "mu mismatch (small batch)"
    assert jnp.allclose(sigma_sq, sig_ref, atol=1e-3, rtol=1e-3), \
        "sigma_sq mismatch (small batch)"

    # Larger, non-divisible batch exercising the multi-block grid + the
    # unpadded (masked partial last block) path.
    batch2 = 300
    x2 = jax.random.normal(kx2, (batch2, state_dim), jnp.float32)
    mu2, sig2 = reinforce_policy_forward(x2, params)
    jax.block_until_ready((mu2, sig2))
    mu2_ref, sig2_ref = _reference_forward(x2, params)
    assert mu2.shape == (batch2, action_dim) and sig2.shape == (batch2, action_dim)
    assert jnp.allclose(mu2, mu2_ref, atol=1e-3, rtol=1e-3), "mu mismatch (gridded batch)"
    assert jnp.allclose(sig2, sig2_ref, atol=1e-3, rtol=1e-3), \
        "sigma_sq mismatch (gridded batch)"

    print("KERNEL_OK")
</pallas_src>

<mosaic_0001>
module attributes {stable_mosaic.version = 11 : i64} {
  func.func @_policy_kernel(%arg0: i32, %arg1: memref<16x2xf32, #tpu.memory_space<vmem>>, %arg2: memref<32x16xf32, #tpu.memory_space<vmem>>, %arg3: memref<32x1xf32, #tpu.memory_space<vmem>>, %arg4: memref<16x32xf32, #tpu.memory_space<vmem>>, %arg5: memref<16x1xf32, #tpu.memory_space<vmem>>, %arg6: memref<8x16xf32, #tpu.memory_space<vmem>>, %arg7: memref<8x1xf32, #tpu.memory_space<vmem>>, %arg8: memref<8x2xf32, #tpu.memory_space<vmem>>) attributes {dimension_semantics = [#tpu.dimension_semantics<parallel>], iteration_bounds = array<i64: 1>, scalar_prefetch = 0 : i64, scratch_operands = 0 : i64, tpu.core_type = #tpu.core_type<tc>, window_params = [{transform_indices = @transform_0, window_bounds = array<i64: 16, 2>}, {pipeline_mode = #tpu.pipeline_mode<synchronous>, transform_indices = @transform_1, window_bounds = array<i64: 32, 16>}, {pipeline_mode = #tpu.pipeline_mode<synchronous>, transform_indices = @transform_2, window_bounds = array<i64: 32, 1>}, {pipeline_mode = #tpu.pipeline_mode<synchronous>, transform_indices = @transform_3, window_bounds = array<i64: 16, 32>}, {pipeline_mode = #tpu.pipeline_mode<synchronous>, transform_indices = @transform_4, window_bounds = array<i64: 16, 1>}, {pipeline_mode = #tpu.pipeline_mode<synchronous>, transform_indices = @transform_5, window_bounds = array<i64: 8, 16>}, {pipeline_mode = #tpu.pipeline_mode<synchronous>, transform_indices = @transform_6, window_bounds = array<i64: 8, 1>}, {transform_indices = @transform_7, window_bounds = array<i64: 8, 2>}]} {
    %c0 = arith.constant 0 : index
    %c0_0 = arith.constant 0 : index
    %0 = vector.load %arg1[%c0, %c0_0] : memref<16x2xf32, #tpu.memory_space<vmem>>, vector<16x2xf32>
    %c0_1 = arith.constant 0 : index
    %c0_2 = arith.constant 0 : index
    %1 = vector.load %arg2[%c0_1, %c0_2] : memref<32x16xf32, #tpu.memory_space<vmem>>, vector<32x16xf32>
    %cst = arith.constant dense<0.000000e+00> : vector<32x2xf32>
    %2 = tpu.matmul %1, %0, %cst {dimension_numbers = #tpu.dot_dimension_numbers<[1], [0], [0], [1], [0, 0, 1, 1], [], []>} : vector<32x16xf32>, vector<16x2xf32>, vector<32x2xf32> -> vector<32x2xf32>
    %c0_3 = arith.constant 0 : index
    %c0_4 = arith.constant 0 : index
    %3 = vector.load %arg3[%c0_3, %c0_4] : memref<32x1xf32, #tpu.memory_space<vmem>>, vector<32x1xf32>
    %4 = vector.broadcast %3 : vector<32x1xf32> to vector<32x2xf32>
    %5 = arith.addf %2, %4 : vector<32x2xf32>
    %cst_5 = arith.constant 0.000000e+00 : f32
    %6 = vector.broadcast %cst_5 : f32 to vector<32x2xf32>
    %7 = arith.maximumf %5, %6 : vector<32x2xf32>
    %c0_6 = arith.constant 0 : index
    %c0_7 = arith.constant 0 : index
    %8 = vector.load %arg4[%c0_6, %c0_7] : memref<16x32xf32, #tpu.memory_space<vmem>>, vector<16x32xf32>
    %cst_8 = arith.constant dense<0.000000e+00> : vector<16x2xf32>
    %9 = tpu.matmul %8, %7, %cst_8 {dimension_numbers = #tpu.dot_dimension_numbers<[1], [0], [0], [1], [0, 0, 1, 1], [], []>} : vector<16x32xf32>, vector<32x2xf32>, vector<16x2xf32> -> vector<16x2xf32>
    %c0_9 = arith.constant 0 : index
    %c0_10 = arith.constant 0 : index
    %10 = vector.load %arg5[%c0_9, %c0_10] : memref<16x1xf32, #tpu.memory_space<vmem>>, vector<16x1xf32>
    %11 = vector.broadcast %10 : vector<16x1xf32> to vector<16x2xf32>
    %12 = arith.addf %9, %11 : vector<16x2xf32>
    %cst_11 = arith.constant 0.000000e+00 : f32
    %13 = vector.broadcast %cst_11 : f32 to vector<16x2xf32>
    %14 = arith.maximumf %12, %13 : vector<16x2xf32>
    %c0_12 = arith.constant 0 : index
    %c0_13 = arith.constant 0 : index
    %15 = vector.load %arg6[%c0_12, %c0_13] : memref<8x16xf32, #tpu.memory_space<vmem>>, vector<8x16xf32>
    %cst_14 = arith.constant dense<0.000000e+00> : vector<8x2xf32>
    %16 = tpu.matmul %15, %14, %cst_14 {dimension_numbers = #tpu.dot_dimension_numbers<[1], [0], [0], [1], [0, 0, 1, 1], [], []>} : vector<8x16xf32>, vector<16x2xf32>, vector<8x2xf32> -> vector<8x2xf32>
    %c0_15 = arith.constant 0 : index
    %c0_16 = arith.constant 0 : index
    %17 = vector.load %arg7[%c0_15, %c0_16] : memref<8x1xf32, #tpu.memory_space<vmem>>, vector<8x1xf32>
    %18 = vector.broadcast %17 : vector<8x1xf32> to vector<8x2xf32>
    %19 = arith.addf %16, %18 : vector<8x2xf32>
    %c0_17 = arith.constant 0 : index
    %c0_18 = arith.constant 0 : index
    %20 = vector.load %arg8[%c0_17, %c0_18] : memref<8x2xf32, #tpu.memory_space<vmem>>, vector<8x2xf32>
    tpu.vector_store %arg8[%c0_17, %c0_18], %19 {strides = array<i32>} : memref<8x2xf32, #tpu.memory_space<vmem>>, vector<8x2xf32>,
    return
  }
  func.func @transform_0(%arg0: i32) -> (i32, i32) {
    %c0_i32 = arith.constant 0 : i32
    %c0_i32_0 = arith.constant 0 : i32
    return %c0_i32, %arg0 : i32, i32
  }
  func.func @transform_1(%arg0: i32) -> (i32, i32) {
    %c0_i32 = arith.constant 0 : i32
    %c0_i32_0 = arith.constant 0 : i32
    %c0_i32_1 = arith.constant 0 : i32
    return %c0_i32, %c0_i32_0 : i32, i32
  }
  func.func @transform_2(%arg0: i32) -> (i32, i32) {
    %c0_i32 = arith.constant 0 : i32
    %c0_i32_0 = arith.constant 0 : i32
    %c0_i32_1 = arith.constant 0 : i32
    return %c0_i32, %c0_i32_0 : i32, i32
  }
  func.func @transform_3(%arg0: i32) -> (i32, i32) {
    %c0_i32 = arith.constant 0 : i32
    %c0_i32_0 = arith.constant 0 : i32
    %c0_i32_1 = arith.constant 0 : i32
    return %c0_i32, %c0_i32_0 : i32, i32
  }
  func.func @transform_4(%arg0: i32) -> (i32, i32) {
    %c0_i32 = arith.constant 0 : i32
    %c0_i32_0 = arith.constant 0 : i32
    %c0_i32_1 = arith.constant 0 : i32
    return %c0_i32, %c0_i32_0 : i32, i32
  }
  func.func @transform_5(%arg0: i32) -> (i32, i32) {
    %c0_i32 = arith.constant 0 : i32
    %c0_i32_0 = arith.constant 0 : i32
    %c0_i32_1 = arith.constant 0 : i32
    return %c0_i32, %c0_i32_0 : i32, i32
  }
  func.func @transform_6(%arg0: i32) -> (i32, i32) {
    %c0_i32 = arith.constant 0 : i32
    %c0_i32_0 = arith.constant 0 : i32
    %c0_i32_1 = arith.constant 0 : i32
    return %c0_i32, %c0_i32_0 : i32, i32
  }
  func.func @transform_7(%arg0: i32) -> (i32, i32) {
    %c0_i32 = arith.constant 0 : i32
    %c0_i32_0 = arith.constant 0 : i32
    return %c0_i32, %arg0 : i32, i32
  }
}

</mosaic_0001>

<bundles_post_ra>
// kernel: tpu_custom_call.1
= control target key start
LH: loop header
LB: loop body
LE: loop exit
PB: predicated region body
PF: predicated region fallthrough
CT: control target
= control target key end

     0   :  { %vm56_vm0 = vcmask 130048   ;;  %v413_v3 = vmov 0   ;;  %vm172_vm1 = vcmask 261120   ;;  %v414_v35 = vmov 0.0|0.0   ;;  %s515_s0 = inlined_call_operand.vmem [shape: f32[16,2], index: 0, kind: input, shape index: {}]   ;;  %s516_s1 = inlined_call_operand.vmem [shape: f32[32,16], index: 1, kind: input, shape index: {}]   ;;  %s517_s2 = inlined_call_operand.vmem [shape: f32[32,1], index: 2, kind: input, shape index: {}]   ;;  %s518_s4 = inlined_call_operand.vmem [shape: f32[16,1], index: 4, kind: input, shape index: {}]   ;;  %s519_s6 = inlined_call_operand.vmem [shape: f32[8,1], index: 6, kind: input, shape index: {}]   ;;  %s520_s3 = inlined_call_operand.vmem [shape: f32[16,32], index: 3, kind: input, shape index: {}]   ;;  %s521_s5 = inlined_call_operand.vmem [shape: f32[8,16], index: 5, kind: input, shape index: {}]   ;;  %s522_s7 = inlined_call_operand.vmem [shape: f32[8,2], index: 7, kind: output, shape index: {}]  }
   0x1   :  { %v26_v0 = vld [vmem:[%s515_s0] sm:$0xff]  ;;  %v27_v1 = vld [vmem:[%s515_s0 + $0x8] sm:$0xff]  ;;  %411 = vset.pattern.permute.xlu0 %v413_v3  ;;  %412 = vset.pattern.permute.xlu1 %v413_v3  ;;  %v34_v6 = vld [vmem:[%s517_s2 + $0x10] sm:$0xff]  ;;  %vm415_vm2 = vmmov 0   ;;  %v416_v36 = vmov 0.0   ;;  %vm336_vm3 = vcmask 15360  }
   0x2   :  { %v28_v2 = vld [vmem:[%s516_s1] sm:$0xff]  ;;  %v392_v4 = vpack.c.bf16 %v27_v1, %v26_v0  ;;  %v29_v7 = vld [vmem:[%s516_s1 + $0x8] sm:$0xff]  ;;  %48 = vperm.xlu1 %412, %v34_v6   ;;  %v30_v9 = vld [vmem:[%s516_s1 + $0x10] sm:$0xff] }
   0x3   :  { %368 = vmatprep.mubr.msk.f32.mxu0 %vm56_vm0, %v28_v2  ;;  %v32_v5 = vld [vmem:[%s517_s2] sm:$0xff]  ;;  %v33_v8 = vld [vmem:[%s517_s2 + $0x8] sm:$0xff]  ;;  %v35_v10 = vld [vmem:[%s517_s2 + $0x18] sm:$0xff] }
   0x4   :  { %393 = vmatprep.subr.bf16.mxu0 %v392_v4  ;;  %38 = vperm.xlu0 %411, %v32_v5   ;;  %v31_v11 = vld [vmem:[%s516_s1 + $0x18] sm:$0xff]  ;;  %v160_v12 = vld [vmem:[%s518_s4] sm:$0xff]  ;;  %v161_v13 = vld [vmem:[%s518_s4 + $0x8] sm:$0xff] }
   0x5   :  { %395 = vmatpush3.bf16.msra.mxu0 %v392_v4  ;;  %v257_v14 = vld [vmem:[%s519_s6] sm:$0xff]  ;;  %v159_v34 = vld [vmem:[%s520_s3 + $0x8] sm:$0xff] }
   0x6   :  { %53 = vperm.xlu1 %412, %v35_v10   ;;  %v158_v15 = vld [vmem:[%s520_s3] sm:$0xff]  ;;  %404 = vmatprep.subr.bf16.mxu0 %v414_v35 }
   0x7   :  { %382 = vmatprep.mubr.msk.f32.mxu1 %vm172_vm1, %v158_v15  ;;  %v256_v46 = vld [vmem:[%s521_s5] sm:$0xff] }
   0x8   :  { %369 = vmatmul.mubr.msk.f32.vlgmr.msra.gmra.mrb[0].mxu0 %vm56_vm0, %v29_v7  ;;  %43 = vperm.xlu0 %411, %v33_v8  }
   0x9   :  { %371 = vmatprep.mubr.msk.f32.mxu0 %vm56_vm0, %v30_v9 }
   0xa   :  { %169 = vperm.xlu1 %412, %v161_v13  }
   0xc   :  { %372 = vmatmul.mubr.msk.f32.gmra.mrb[2].mxu0 %vm56_vm0, %v31_v11  ;;  %164 = vperm.xlu0 %411, %v160_v12  }
   0xd   :  { %389 = vmatprep.mubr.msk.f32.mxu0 %vm415_vm2, %v416_v36 }
  0x10   :  { %260 = vperm.xlu0 %411, %v257_v14  }
  0x81   :  { %v49_v17 = vpop.permute.xlu1 %48 }
  0x83   :  { %v39_v16 = vpop.permute.xlu0 %38 }
  0x85   :  { %v54_v24 = vpop.permute.xlu1 %53 }
  0x87   :  { %v44_v18 = vpop.permute.xlu0 %43 }
  0x89   :  { %v170_v37 = vpop.permute.xlu1 %169 }
  0x8b   :  { %v165_v39 = vpop.permute.xlu0 %164 }
  0x8f   :  { %v261_v47 = vpop.permute.xlu0 %260 }
  0xdb   :  { %v370_v19 = vpop.f32.mrb[0].mxu0 }
  0xdc   :  { %v141_v20 = vadd.f32 %v370_v19, %v44_v18  ;;  %v135_v21 = vpop.f32.mrb[1].mxu0 }
  0xdd   :  { %v136_v22 = vadd.f32 %v135_v21, %v39_v16 }
  0xde   :  { %v155_v23 = vmax.f32 %v141_v20, 0.0 }
  0xdf   :  { %v154_v25 = vmax.f32 %v136_v22, 0.0  ;;  %v373_v26 = vpop.f32.mrb[2].mxu0 }
  0xe0   :  { %v151_v27 = vadd.f32 %v373_v26, %v54_v24  ;;  %v145_v28 = vpop.f32.mrb[3].mxu0 }
  0xe1   :  { %v146_v29 = vadd.f32 %v145_v28, %v49_v17  ;;  %v396_v30 = vpack.c.bf16 %v155_v23, %v154_v25 }
  0xe2   :  { %v157_v31 = vmax.f32 %v151_v27, 0.0 }
  0xe3   :  { %v156_v32 = vmax.f32 %v146_v29, 0.0  ;;  %397 = vmatprep.subr.bf16.mxu1 %v396_v30 }
  0xe4   :  { %399 = vmatpush3.bf16.msra.mxu1 %v396_v30 }
  0xe5   :  { %v400_v33 = vpack.c.bf16 %v157_v31, %v156_v32 }
  0xe7   :  { %401 = vmatprep.subr.bf16.mxu1 %v400_v33 }
  0xe8   :  { %403 = vmatpush3.bf16.msra.mxu1 %v400_v33 }
  0xeb   :  { %383 = vmatmul.mubr.msk.f32.vlgmr.msra.gmra.mrb[0].mxu1 %vm172_vm1, %v159_v34 }
 0x1be   :  { %v384_v38 = vpop.f32.mrb[0].mxu1 }
 0x1bf   :  { %v251_v40 = vadd.f32 %v384_v38, %v170_v37  ;;  %v245_v41 = vpop.f32.mrb[1].mxu1 }
 0x1c0   :  { %v246_v42 = vadd.f32 %v245_v41, %v165_v39 }
 0x1c1   :  { %v255_v43 = vmax.f32 %v251_v40, 0.0 }
 0x1c2   :  { %v254_v44 = vmax.f32 %v246_v42, 0.0 }
 0x1c4   :  { %v405_v45 = vpack.c.bf16 %v255_v43, %v254_v44 }
 0x1c6   :  { %406 = vmatpush3.bf16.msra.mxu0 %v405_v45 }
 0x1c9   :  { %390 = vmatmul.mubr.msk.f32.vlgmr.msra.gmra.mrb[4].mxu0 %vm56_vm0, %v256_v46 }
 0x29c   :  { %v332_v48 = vpop.f32.mrb[4].mxu0 }
 0x29d   :  { %v333_v49 = vadd.f32 %v332_v48, %v261_v47  ;;  %v391_v50 = vpop.f32.mrb[5].mxu0 }
 0x29f   :  { %337 = vst.msk [vmem:[%s522_s7] sm:$0xff] %vm336_vm3, %v333_v49 }

</bundles_post_ra>
